<compile_context>
chip_gen: v7x
topology: tpu7x:2x2x1
jax: 0.10.0
libtpu: 0.0.40
codegen_flags: <defaults>
</compile_context>

<pallas_src>
import functools

import jax
import jax.numpy as jnp
from jax.experimental import pallas as pl
from jax.experimental.pallas import tpu as pltpu

EPS = 1e-5
_MIN_BLOCKS = 8                          # target grid steps (megacore + pipelining)
_TARGET_STEP_BYTES = 4 * 1024 * 1024     # aim for >= ~4 MiB of x per grid step


def _round_up(x, m):
    return ((x + m - 1) // m) * m


def _sublane(dtype):
    # 8 sublanes for 4-byte dtypes, 16 for bf16, 32 for 1-byte dtypes.
    return max(8, 32 // jnp.dtype(dtype).itemsize)


def _vmem_budgets():
    """Return (tile_budget_bytes, vmem_limit_bytes), generation-aware."""
    try:
        cap = pltpu.get_tpu_info().vmem_capacity_bytes
    except Exception:
        cap = 0
    if cap >= 96 * 1024 * 1024:
        # v5e / v6e: 128 MiB VMEM — use big double-buffered tiles.
        return 48 * 1024 * 1024, 64 * 1024 * 1024
    # v7x (64 MiB per TensorCore) or unknown: stay conservative.
    return 36 * 1024 * 1024, 48 * 1024 * 1024


def _choose_tile_rows(rows, hidden, dtype, budget):
    """Pick a sublane-aligned row tile: big enough to amortize per-step
    overhead, small enough to fit the VMEM budget and keep >= 2 grid blocks."""
    itemsize = jnp.dtype(dtype).itemsize
    sub = _sublane(dtype)
    row_bytes = hidden * itemsize
    # Hard cap: double-buffered input + output tiles must fit the budget.
    max_tile = max(sub, ((budget // (4 * row_bytes)) // sub) * sub)
    # Aim for >= _MIN_BLOCKS grid steps ...
    split_tile = _round_up(pl.cdiv(rows, _MIN_BLOCKS), sub)
    tile = min(split_tile, max_tile)
    # ... but never drop below ~_TARGET_STEP_BYTES of x per step (per-step
    # overhead would otherwise dominate), unless VMEM forces it.
    floor_tile = _round_up(max(1, _TARGET_STEP_BYTES // row_bytes), sub)
    tile = max(tile, min(floor_tile, max_tile))
    # Always leave >= 2 blocks when there are enough rows (keeps both v7x
    # TensorCores busy under the "parallel" grid dimension).
    half_tile = _round_up(pl.cdiv(rows, 2), sub)
    tile = min(tile, max(half_tile, sub))
    # Never bigger than the (sublane-rounded) total row count.
    tile = min(tile, _round_up(rows, sub))
    return int(max(tile, sub))


def _layernorm_kernel(x_ref, p_ref, o_ref):
    # x_ref: (tile_rows, hidden); p_ref: (2, hidden) = [weight ; bias].
    # Tail grid block: out-of-range rows may hold garbage and produce NaN/Inf,
    # but rows are independent and their stores are masked by Pallas, so
    # nothing escapes. (Do not fuse a cross-row reduction here without masking.)
    hidden = x_ref.shape[-1]
    xf = x_ref[...].astype(jnp.float32)
    w = p_ref[0:1, :].astype(jnp.float32)          # (1, hidden)
    b = p_ref[1:2, :].astype(jnp.float32)          # (1, hidden)
    inv_h = jnp.float32(1.0 / hidden)
    mean = jnp.sum(xf, axis=-1, keepdims=True) * inv_h
    xc = xf - mean                                  # two-pass variance: matches
    var = jnp.sum(xc * xc, axis=-1, keepdims=True) * inv_h   # F.layer_norm precision
    inv = jax.lax.rsqrt(var + jnp.float32(EPS))
    o_ref[...] = (xc * inv * w + b).astype(o_ref.dtype)


@functools.partial(jax.jit, static_argnames=("tile_rows",))
def layer_norm(x, weight, bias=None, *, tile_rows=None):
    """LayerNorm over the last axis of x. weight: (hidden,), bias: (hidden,)|None."""
    orig_shape = x.shape
    hidden = orig_shape[-1]
    rows = 1
    for d in orig_shape[:-1]:
        rows *= d
    x2 = x.reshape(rows, hidden)

    # Merge weight + bias into one (2, hidden) slab -> one param DMA stream.
    # Adding a zero bias in f32 is exact, so the no-bias path reuses the kernel.
    b_row = bias if bias is not None else jnp.zeros_like(weight)
    params = jnp.stack([weight, b_row])

    budget, vmem_limit = _vmem_budgets()
    if tile_rows is None:
        tile_rows = _choose_tile_rows(rows, hidden, x.dtype, budget)

    grid = (pl.cdiv(rows, tile_rows),)   # tail block masked by Pallas

    itemsize = jnp.dtype(x.dtype).itemsize
    cost = pl.CostEstimate(
        flops=8 * rows * hidden,
        transcendentals=rows,
        bytes_accessed=2 * rows * hidden * itemsize
        + 2 * hidden * jnp.dtype(params.dtype).itemsize,
    )

    out = pl.pallas_call(
        _layernorm_kernel,
        out_shape=jax.ShapeDtypeStruct((rows, hidden), x.dtype),
        grid=grid,
        in_specs=[
            # Last dim = FULL hidden (exempt from the 128-lane divisibility rule),
            # so no wrapper pad/slice HBM passes for odd hidden sizes.
            pl.BlockSpec((tile_rows, hidden), lambda i: (i, 0)),
            pl.BlockSpec((2, hidden), lambda i: (0, 0)),
        ],
        out_specs=pl.BlockSpec((tile_rows, hidden), lambda i: (i, 0)),
        compiler_params=pltpu.CompilerParams(
            dimension_semantics=("parallel",),   # shard blocks across v7x TCs
            vmem_limit_bytes=vmem_limit,
        ),
        cost_estimate=cost,
    )(x2, params)

    return out.reshape(orig_shape)


def _reference(x, weight, bias):
    mean = jnp.mean(x, axis=-1, keepdims=True)
    var = jnp.mean((x - mean) ** 2, axis=-1, keepdims=True)
    y = (x - mean) / jnp.sqrt(var + EPS) * weight
    if bias is not None:
        y = y + bias
    return y


if __name__ == "__main__":
    # Module: LayerNorm(ndim=hidden, bias=True)
    batch, seq, hidden = 2, 8, 32
    key = jax.random.PRNGKey(0)
    x = jax.random.normal(key, (batch, seq, hidden), dtype=jnp.float32)

    # Deterministic parameter init, matching nn.Parameter(torch.ones/zeros(ndim))
    weight = jnp.ones((hidden,), dtype=jnp.float32)
    bias = jnp.zeros((hidden,), dtype=jnp.float32)

    y = jax.block_until_ready(layer_norm(x, weight, bias))
    ref = _reference(x, weight, bias)
    assert jnp.allclose(y, ref, atol=1e-5, rtol=1e-5), "mismatch vs reference"

    # bias=None path (LayerNorm(ndim, bias=False))
    y_nb = jax.block_until_ready(layer_norm(x, weight, None))
    ref_nb = _reference(x, weight, None)
    assert jnp.allclose(y_nb, ref_nb, atol=1e-5, rtol=1e-5), "mismatch (no bias)"

    # Non-divisible rows + lane-aligned hidden: exercises the cdiv/tail path.
    k2 = jax.random.PRNGKey(1)
    x2 = jax.random.normal(k2, (3, 5, 256), dtype=jnp.float32)
    w2 = jax.random.normal(jax.random.PRNGKey(2), (256,), dtype=jnp.float32)
    b2 = jax.random.normal(jax.random.PRNGKey(3), (256,), dtype=jnp.float32)
    y2 = jax.block_until_ready(layer_norm(x2, w2, b2, tile_rows=8))
    ref2 = _reference(x2, w2, b2)
    assert jnp.allclose(y2, ref2, atol=1e-5, rtol=1e-5), "mismatch (tail block)"

    # Non-multiple-of-128 hidden: exercises the unpadded full-hidden block path.
    x3 = jax.random.normal(jax.random.PRNGKey(4), (4, 7, 100), dtype=jnp.float32)
    w3 = jax.random.normal(jax.random.PRNGKey(5), (100,), dtype=jnp.float32)
    b3 = jax.random.normal(jax.random.PRNGKey(6), (100,), dtype=jnp.float32)
    y3 = jax.block_until_ready(layer_norm(x3, w3, b3))
    ref3 = _reference(x3, w3, b3)
    assert jnp.allclose(y3, ref3, atol=1e-5, rtol=1e-5), "mismatch (odd hidden)"

    print("KERNEL_OK")
</pallas_src>

<mosaic_0001>
module attributes {stable_mosaic.version = 11 : i64} {
  func.func @_layernorm_kernel(%arg0: i32, %arg1: memref<8x32xf32, #tpu.memory_space<vmem>>, %arg2: memref<2x32xf32, #tpu.memory_space<vmem>>, %arg3: memref<8x32xf32, #tpu.memory_space<vmem>>) attributes {dimension_semantics = [#tpu.dimension_semantics<parallel>], iteration_bounds = array<i64: 2>, scalar_prefetch = 0 : i64, scratch_operands = 0 : i64, tpu.core_type = #tpu.core_type<tc>, window_params = [{transform_indices = @transform_0, window_bounds = array<i64: 8, 32>}, {pipeline_mode = #tpu.pipeline_mode<synchronous>, transform_indices = @transform_1, window_bounds = array<i64: 2, 32>}, {transform_indices = @transform_2, window_bounds = array<i64: 8, 32>}]} {
    %c0 = arith.constant 0 : index
    %c0_0 = arith.constant 0 : index
    %0 = vector.load %arg1[%c0, %c0_0] : memref<8x32xf32, #tpu.memory_space<vmem>>, vector<8x32xf32>
    %c0_1 = arith.constant 0 : index
    %c0_2 = arith.constant 0 : index
    %1 = vector.load %arg2[%c0_1, %c0_2] : memref<2x32xf32, #tpu.memory_space<vmem>>, vector<1x32xf32>
    %c1 = arith.constant 1 : index
    %c0_3 = arith.constant 0 : index
    %2 = vector.load %arg2[%c1, %c0_3] : memref<2x32xf32, #tpu.memory_space<vmem>>, vector<1x32xf32>
    %cst = arith.constant dense<0.000000e+00> : vector<8xf32>
    %3 = vector.multi_reduction <add>, %0, %cst [1] : vector<8x32xf32> to vector<8xf32>
    %4 = vector.shape_cast %3 : vector<8xf32> to vector<8x1xf32>
    %cst_4 = arith.constant 3.125000e-02 : f32
    %5 = vector.broadcast %cst_4 : f32 to vector<8x1xf32>
    %6 = arith.mulf %4, %5 : vector<8x1xf32>
    %7 = vector.broadcast %6 : vector<8x1xf32> to vector<8x32xf32>
    %8 = arith.subf %0, %7 : vector<8x32xf32>
    %9 = arith.mulf %8, %8 : vector<8x32xf32>
    %cst_5 = arith.constant dense<0.000000e+00> : vector<8xf32>
    %10 = vector.multi_reduction <add>, %9, %cst_5 [1] : vector<8x32xf32> to vector<8xf32>
    %11 = vector.shape_cast %10 : vector<8xf32> to vector<8x1xf32>
    %cst_6 = arith.constant 3.125000e-02 : f32
    %12 = vector.broadcast %cst_6 : f32 to vector<8x1xf32>
    %13 = arith.mulf %11, %12 : vector<8x1xf32>
    %cst_7 = arith.constant 9.99999974E-6 : f32
    %14 = vector.broadcast %cst_7 : f32 to vector<8x1xf32>
    %15 = arith.addf %13, %14 : vector<8x1xf32>
    %16 = math.rsqrt %15 : vector<8x1xf32>
    %17 = vector.broadcast %16 : vector<8x1xf32> to vector<8x32xf32>
    %18 = arith.mulf %8, %17 : vector<8x32xf32>
    %19 = vector.broadcast %1 : vector<1x32xf32> to vector<8x32xf32>
    %20 = arith.mulf %18, %19 : vector<8x32xf32>
    %21 = vector.broadcast %2 : vector<1x32xf32> to vector<8x32xf32>
    %22 = arith.addf %20, %21 : vector<8x32xf32>
    %c0_8 = arith.constant 0 : index
    %c0_9 = arith.constant 0 : index
    %23 = vector.load %arg3[%c0_8, %c0_9] : memref<8x32xf32, #tpu.memory_space<vmem>>, vector<8x32xf32>
    tpu.vector_store %arg3[%c0_8, %c0_9], %22 {strides = array<i32>} : memref<8x32xf32, #tpu.memory_space<vmem>>, vector<8x32xf32>,
    return
  }
  func.func @transform_0(%arg0: i32) -> (i32, i32) {
    %c0_i32 = arith.constant 0 : i32
    %c0_i32_0 = arith.constant 0 : i32
    return %arg0, %c0_i32 : i32, i32
  }
  func.func @transform_1(%arg0: i32) -> (i32, i32) {
    %c0_i32 = arith.constant 0 : i32
    %c0_i32_0 = arith.constant 0 : i32
    %c0_i32_1 = arith.constant 0 : i32
    return %c0_i32, %c0_i32_0 : i32, i32
  }
  func.func @transform_2(%arg0: i32) -> (i32, i32) {
    %c0_i32 = arith.constant 0 : i32
    %c0_i32_0 = arith.constant 0 : i32
    return %arg0, %c0_i32 : i32, i32
  }
}

</mosaic_0001>

<bundles_post_ra>
// kernel: layer_norm.1
= control target key start
LH: loop header
LB: loop body
LE: loop exit
PB: predicated region body
PF: predicated region fallthrough
CT: control target
= control target key end

     0   :  { %7 = vsyncpa [#allocation3], 0  ;;  %s618_s0 = inlined_call_operand.hbm [shape: f32[16,32], index: 0, kind: input, shape index: {}]   ;;  %s619_s1 = inlined_call_operand.vmem [shape: f32[2,32], index: 1, kind: input, shape index: {}]   ;;  %s620_s2 = inlined_call_operand.hbm [shape: f32[16,32], index: 2, kind: output, shape index: {}]  }
   0x1   :  { %9 = vsyncpa [#allocation3 + $0x1], 0 }
   0x2   :  { %10 = vsyncpa [#allocation4], 0 }
   0x3   :  { %12 = vsyncpa [#allocation4 + $0x1], 0  ;;  %s448_s9 = smov 0   ;;  %s450_s10 = smov 0  }
   0x4   :  { %s452_s11 = smov 0   ;;  %s454_s12 = smov 0  }
   0x5 LB: > { %s469_s13 = sadd.s32 4294967295, %s429_s12   ;;  %s271_s14 = sadd.s32 4294967294, %s429_s12   ;;  %s429_s12 = sphi %s454_s12, %s635_s12   ;;  %s425_s11 = sphi %s452_s11, %s634_s11   ;;  %s421_s10 = sphi %s450_s10, %s633_s10   ;;  %s417_s9 = sphi %s448_s9, %s632_s9  }
   0x6   : > { %s473_s15 = sadd.s32 1, %s429_s12   ;;  %s25_s16 = sadd.s32 1, %s425_s11 }
   0x7   : > { %s22_s17 = ssub.s32 %s429_s12, %s473_s15  ;;  %p32_p0 = scmp.ne.s32.totalorder %s425_s11, %s421_s10 }
   0x8   : > { %p23_p1 = scmp.eq.s32.totalorder %s22_s17, 0  ;;  %p33_p2 = scmp.eq.s32.totalorder %s429_s12, 0 }
   0x9   : > { %p38_p3 = scmp.ne.s32.totalorder %s421_s10, %s417_s9  ;;  %p39_p4 = scmp.eq.s32.totalorder %s469_s13, 0 }
   0xa   : > { %s485_s18 = scalar_select %p23_p1, %s425_s11, %s25_s16  }
   0xb   : > { %p487_p5 = por %p33_p2, %p32_p0  ;;  %p491_p6 = por %p39_p4, %p38_p3 }
   0xc   : > { %p83_p7 = scmp.eq.s32.totalorder %s469_s13, 1  ;;  %p89_p8 = scmp.eq.s32.totalorder %s271_s14, 1 }
   0xd   : > { %p297_p10 = scmp.lt.s32.totalorder %s429_s12, 2  ;;  %s112_s23 = sand.u32 1, %s425_s11  }
   0xe   : > { %p498_p11 = por %p83_p7, %p32_p0  ;;  %p502_p12 = por %p89_p8, %p38_p3 }
   0xf   : > { %s275_s24 = sshll.u32 %s429_s12, 7  ;;  %s274_s25 = sshll.u32 %s112_s23, 3 }
  0x10   : > { %s624_s21 = scalar_select %p498_p11, 1, 0 }
  0x11   : > { %s625_s22 = scalar_select %p502_p12, 1, 0 }
  0x12   : > { %s511_s28 = scalar_lea.hbm %s618_s0, %s275_s24  ;;  %s116_s29 = scalar_lea.vmem [#allocation2], %s274_s25 }
  0x13   : > { %s123_s30 = sshll.u32 %s116_s29, 4  ;;  %p515_p13 = pnand %p297_p10, %p487_p5  ;;  %s519_s30 = int_to_ptr.vmem [resolvable:$true] %s123_s30 }
  0x14   : > { %s113_s4 = scalar_lea.sflag [#allocation3], %s112_s23  ;;  %s333_s5 = scalar_lea.hbm %s511_s28, 128 }
  0x15   : > { %p334_p2 = scmp.ne.s32.totalorder %s511_s28, %s333_s5  ;;  %p335_p3 = pneg %p515_p13 }
  0x16   : > { %s338_s8 = scalar_lea.hbm %s618_s0, 256  ;;  %p339_p5 = scmp.lt.u32.totalorder %s511_s28, %s618_s0 }
  0x17   : > { %p336_p4 = pnand %p335_p3, %p334_p2  ;;  %p340_p8 = scmp.lt.u32.totalorder %s338_s8, %s333_s5 }
  0x18   : > { %p342_p9 = scmp.lt.u32.totalorder %s333_s5, %s511_s28 }
  0x19   : > { %p337_p7 = pneg %p336_p4  ;;  %p341_p10 = por %p340_p8, %p339_p5 }
  0x1b   : > { %p343_p0 = por %p342_p9, %p341_p10 }
  0x1d   : > { %p344_p1 = pnand %p343_p0, %p337_p7 }
  0x1f   : > { %347 = shalt.err (!%p344_p1)
}
  0x20   : > { %s348_s17 = scalar_lea.vmem %s519_s30, 128  ;;  %s431_s19 = smov [#allocation2]  }
  0x21   : > { %p349_p2 = scmp.ne.s32.totalorder %s519_s30, %s348_s17  ;;  %s353_s23 = sshll.u32 %s431_s19, 4  ;;  %s354_s23 = int_to_ptr.vmem [resolvable:$false] %s353_s23 }
  0x22   : > { %s355_s24 = scalar_lea.vmem %s354_s23, 256  ;;  %p356_p11 = scmp.lt.s32.totalorder %s519_s30, %s354_s23 }
  0x23   : > { %p351_p4 = pnand %p349_p2, %p335_p3  ;;  %p357_p5 = scmp.lt.s32.totalorder %s355_s24, %s348_s17 }
  0x25   : > { %p352_p12 = pneg %p351_p4  ;;  %p358_p8 = por %p357_p5, %p356_p11 }
  0x27   : > { %p359_p9 = pnand %p358_p8, %p352_p12 }
  0x29   : > { %362 = shalt.err (!%p359_p9)
}
  0x2a   : > { %292 = dma.hbm_to_vmem [thread:$0]  (!%p515_p13), %s511_s28, 128, %s519_s30, %s113_s4  }
  0x2b   : > { %p627_p0 = scmp.lt.s32.totalorder %s429_s12, 3  ;;  %p628_p1 = scmp.ge.s32.totalorder %s429_s12, 1 }
  0x2d   : > { %p129_p3 = pnand %p628_p1, %p627_p0 }
  0x2e   : > { %s553_s25 = sand.u32 (!%p129_p3), 1, %s421_s10  }
  0x2f   : > { %132 = sbr.rel (%p129_p3) target bundleno = 383 (0x17f), region = 28  ;;  %s277_s26 = sshll.u32 (!%p129_p3), %s553_s25, 3 }
  0x30   : > { %s135_s27 = scalar_lea.sflag (!%p129_p3), [#allocation3], %s553_s25  ;;  %s138_s29 = scalar_lea.vmem (!%p129_p3), [#allocation2], %s277_s26 }
  0x36   : > { %408 = dma.done.wait (%p491_p6), %s135_s27, 128  }
  0x37   : > { %410 = vsyncadd (%p491_p6), %s135_s27, 4294967168  ;;  %vm162_vm0 = vcmask 261120   ;;  %v159_v0 = vld [vmem:[%s138_s29] sm:$0xff]  ;;  %s282_s4 = sshll.u32 %s469_s13, 7  ;;  %s158_s5 = scalar_lea.vmem [#allocation5], %s277_s26 }
  0x38   : > { %v163_v1 = vsel %vm162_vm0, %v159_v0, 0.0  ;;  %v279_v11 = vld [vmem:[%s619_s1] ss:$0 sm:$0xff]  ;;  %v280_v13 = vld [vmem:[%s619_s1 + $0x1] ss:$0 sm:$0xff]  ;;  %s201_s6 = sshll.u32 %s158_s5, 4  ;;  %s573_s14 = scalar_lea.hbm %s620_s2, %s282_s4  ;;  %s575_s6 = int_to_ptr.vmem [resolvable:$true] %s201_s6 }
  0x39   : > { %164 = vadd.xlane.f32.xlu0 %v163_v1  ;;  %s188_s16 = scalar_lea.sflag [#allocation4], %s553_s25  ;;  %s363_s17 = scalar_lea.vmem %s575_s6, 128 }
  0x3a   : > { %p364_p6 = scmp.ne.s32.totalorder %s575_s6, %s363_s17  ;;  %p629_p11 = scmp.ne.s32.totalorder %s624_s21, 0 }
  0x3b   : > { %s432_s13 = smov [#allocation5]  }
  0x3c   : > { %p365_p12 = pnand %p364_p6, %p629_p11  ;;  %s367_s19 = sshll.u32 %s432_s13, 4  ;;  %s368_s19 = int_to_ptr.vmem [resolvable:$false] %s367_s19 }
  0x3d   : > { %s369_s23 = scalar_lea.vmem %s368_s19, 256  ;;  %p370_p7 = scmp.lt.s32.totalorder %s575_s6, %s368_s19 }
  0x3e   : > { %p366_p13 = pneg %p365_p12  ;;  %p371_p10 = scmp.lt.s32.totalorder %s369_s23, %s363_s17 }
  0x40   : > { %p372_p2 = por %p371_p10, %p370_p7 }
  0x42   : > { %p373_p4 = pnand %p372_p2, %p366_p13 }
  0xc6   : > { %v165_v2 = vpop.xlane.xlu0 %164 }
  0xc7   : > { %v166_v3 = vmul.f32 0.03125, %v165_v2 }
  0xc9   : > { %v167_v4 = vsub.f32 %v159_v0, %v166_v3 }
  0xcb   : > { %v168_v5 = vmul.f32 %v167_v4, %v167_v4 }
  0xcd   : > { %v169_v6 = vsel %vm162_vm0, %v168_v5, 0.0 }
  0xce   : > { %170 = vadd.xlane.f32.xlu0 %v169_v6 }
 0x15b   : > { %v171_v7 = vpop.xlane.xlu0 %170 }
 0x15c   : > { %v172_v8 = vmul.f32 0.03125, %v171_v7 }
 0x15e   : > { %v173_v9 = vadd.f32 1e-05, %v172_v8 }
 0x160   : > { %331 = vrsqrt.f32 %v173_v9 }
 0x16a   : > { %v332_v10 = vpop.eup %331 }
 0x16b   : > { %v175_v12 = vmul.f32 %v332_v10, %v167_v4 }
 0x16d   : > { %v180_v14 = vmul.f32 %v279_v11, %v175_v12 }
 0x16f   : > { %v185_v15 = vadd.f32 %v280_v13, %v180_v14 }
 0x171   : > { %186 = vst.msk [vmem:[%s158_s5] sm:$0xff] %vm162_vm0, %v185_v15 }
 0x172   : > { %376 = shalt.err (!%p373_p4)
}
 0x173   : > { %s377_s24 = scalar_lea.hbm %s573_s14, 128  ;;  %s381_s27 = scalar_lea.hbm %s620_s2, 256 }
 0x174   : > { %p378_p5 = scmp.ne.s32.totalorder %s573_s14, %s377_s24  ;;  %p382_p0 = scmp.lt.u32.totalorder %s573_s14, %s620_s2 }
 0x175   : > { %p383_p1 = scmp.lt.u32.totalorder %s381_s27, %s377_s24  ;;  %p385_p6 = scmp.lt.u32.totalorder %s377_s24, %s573_s14 }
 0x176   : > { %p379_p8 = pnand %p378_p5, %p629_p11 }
 0x177   : > { %p384_p3 = por %p383_p1, %p382_p0 }
 0x178   : > { %p380_p9 = pneg %p379_p8 }
 0x179   : > { %p386_p12 = por %p385_p6, %p384_p3 }
 0x17b   : > { %p387_p13 = pnand %p386_p12, %p380_p9 }
 0x17d   : > { %390 = shalt.err (!%p387_p13)
}
 0x17e   : > { %287 = dma.vmem_to_hbm [thread:$0]  (%p629_p11), %s575_s6, 128, %s573_s14, %s188_s16  }
 0x17f PF: > { %s213_s28 = sand.u32 1, %s417_s9   ;;  %p630_p7 = scmp.ne.s32.totalorder %s625_s22, 0 }
 0x180   : > { %p631_p10 = scmp.ge.s32.totalorder %s429_s12, 2  ;;  %s214_s30 = scalar_lea.sflag [#allocation4], %s213_s28 }
 0x182   : > { %p294_p2 = pnand %p631_p10, %p630_p7 }
 0x184   : > { %412 = dma.done.wait (!%p294_p2), %s214_s30, 128  }
 0x185   : > { %414 = vsyncadd (!%p294_p2), %s214_s30, 4294967168  ;;  %p15_p4 = scmp.ge.s32.totalorder %s473_s15, 4   ;;  %s632_s9 = smov %s421_s10 }
 0x186   : > { %s633_s10 = smov %s425_s11  ;;  %s634_s11 = smov %s485_s18 }
 0x187   : > { %s635_s12 = smov %s473_s15  ;;  %17 = sbr.rel (!%p15_p4) target bundleno = 5 (0x5), region = 73 }
 0x18e   :  { %219 = vsyncpa [#allocation3], 1 }
 0x18f   :  { %221 = vsyncpa [#allocation3 + $0x1], 1 }
 0x190   :  { %222 = vsyncpa [#allocation4], 1 }
 0x191   :  { %224 = vsyncpa [#allocation4 + $0x1], 1 }

</bundles_post_ra>
